<compile_context>
chip_gen: v7x
topology: tpu7x:2x2x1
jax: 0.10.0
libtpu: 0.0.40
codegen_flags: <defaults>
</compile_context>

<pallas_src>
import jax
import jax.numpy as jnp
from jax.experimental import pallas as pl
from jax.experimental.pallas import tpu as pltpu

INIT = 0.01


def _round_up(x, m):
    return (x + m - 1) // m * m


def _copy_linear_kernel(ctx_ref, st_ref, inp_ref, vc_ref, vs_ref, vi_ref, b_ref,
                        out_ref):
    # ctx_ref:(tn,Dc)  st_ref:(tn,Ds)  inp_ref:(tn,Di)
    # vc_ref:(Dc,1)    vs_ref:(Ds,1)   vi_ref:(Di,1)   b_ref:(1,) f32 in SMEM
    # out_ref:(tn,1)
    acc = jnp.dot(ctx_ref[...], vc_ref[...], preferred_element_type=jnp.float32)
    acc += jnp.dot(st_ref[...], vs_ref[...], preferred_element_type=jnp.float32)
    acc += jnp.dot(inp_ref[...], vi_ref[...], preferred_element_type=jnp.float32)
    acc += b_ref[0]                                   # scalar f32 from SMEM
    out_ref[...] = acc.astype(out_ref.dtype)


def copy_linear(context, state, input_, v_c, v_s, v_i, b=None, *, tile_n=2048):
    """context:(B,L,Dc)  state:(B,L,Ds)  input_:(B,L,Di)  ->  (B,L,1)

    tile_n = rows per grid step.  Default 2048 (~8 MiB double-buffered VMEM,
    safe on v5e's 16 MiB scoped default).  It is rounded to a multiple of 128,
    clamped to the problem size, and further clamped so the grid has >= ~8
    steps (keeps both v7x TensorCores busy and the DMA pipeline deep).
    """
    B, L, Dc = context.shape
    Ds = state.shape[-1]
    Di = input_.shape[-1]
    N = B * L
    out_dtype = context.dtype

    tile_n = _round_up(max(int(tile_n), 128), 128)
    tile_n = min(tile_n, _round_up(N, 128))
    tile_n = min(tile_n, max(128, _round_up(pl.cdiv(N, 8), 128)))

    # Flat (N, D) views — free reshapes, no HBM copies, no padding.
    ctx2 = context.reshape(N, Dc)
    st2 = state.reshape(N, Ds)
    in2 = input_.reshape(N, Di)

    # Tiny weight columns, pre-cast to f32 once in the wrapper.
    vc2 = v_c.reshape(Dc, 1).astype(jnp.float32)
    vs2 = v_s.reshape(Ds, 1).astype(jnp.float32)
    vi2 = v_i.reshape(Di, 1).astype(jnp.float32)
    b1 = (jnp.zeros((1,), jnp.float32) if b is None
          else b.reshape(1).astype(jnp.float32))

    grid = (pl.cdiv(N, tile_n),)   # ragged last block: OOB reads don't-care,
                                   # OOB output rows dropped (per-row compute only)

    out_flat = pl.pallas_call(
        _copy_linear_kernel,
        out_shape=jax.ShapeDtypeStruct((N, 1), out_dtype),
        grid_spec=pltpu.PrefetchScalarGridSpec(
            num_scalar_prefetch=0,
            grid=grid,
            in_specs=[
                pl.BlockSpec((tile_n, Dc), lambda i: (i, 0)),
                pl.BlockSpec((tile_n, Ds), lambda i: (i, 0)),
                pl.BlockSpec((tile_n, Di), lambda i: (i, 0)),
                pl.BlockSpec((Dc, 1), lambda i: (0, 0)),
                pl.BlockSpec((Ds, 1), lambda i: (0, 0)),
                pl.BlockSpec((Di, 1), lambda i: (0, 0)),
                pl.BlockSpec(memory_space=pltpu.MemorySpace.SMEM),  # bias scalar
            ],
            out_specs=pl.BlockSpec((tile_n, 1), lambda i: (i, 0)),
        ),
        compiler_params=pltpu.CompilerParams(
            dimension_semantics=("parallel",),
            # Footprint at tile_n=2048 is ~8 MiB double-buffered: under the
            # scoped-VMEM default on all generations, so no vmem_limit_bytes.
        ),
    )(ctx2, st2, in2, vc2, vs2, vi2, b1)

    return out_flat.reshape(B, L, 1)


if __name__ == "__main__":
    key = jax.random.PRNGKey(0)
    k_c, k_s, k_i, k_vc, k_vs, k_vi = jax.random.split(key, 6)

    batch, seq = 2, 8
    context_dim, state_dim, input_dim = 32, 64, 16

    # deterministic parameter init mirroring init.uniform_(-INIT, INIT)
    v_c = jax.random.uniform(k_vc, (context_dim,), jnp.float32, -INIT, INIT)
    v_s = jax.random.uniform(k_vs, (state_dim,), jnp.float32, -INIT, INIT)
    v_i = jax.random.uniform(k_vi, (input_dim,), jnp.float32, -INIT, INIT)
    b = jnp.zeros((1,), jnp.float32)

    context = jax.random.normal(k_c, (batch, seq, context_dim), jnp.float32)
    state = jax.random.normal(k_s, (batch, seq, state_dim), jnp.float32)
    input_ = jax.random.normal(k_i, (batch, seq, input_dim), jnp.float32)

    out = copy_linear(context, state, input_, v_c, v_s, v_i, b)
    out = jax.block_until_ready(out)

    # pure-JAX reference (same math as the PyTorch forward)
    ref = (context @ v_c[:, None] + state @ v_s[:, None]
           + input_ @ v_i[:, None] + b[None, :])
    assert out.shape == (batch, seq, 1)
    assert jnp.allclose(out, ref, atol=1e-5, rtol=1e-5)

    print("KERNEL_OK")
</pallas_src>

<mosaic_0001>
module attributes {stable_mosaic.version = 11 : i64} {
  func.func @_copy_linear_kernel(%arg0: i32, %arg1: memref<128x32xf32, #tpu.memory_space<vmem>>, %arg2: memref<128x64xf32, #tpu.memory_space<vmem>>, %arg3: memref<128x16xf32, #tpu.memory_space<vmem>>, %arg4: memref<32x1xf32, #tpu.memory_space<vmem>>, %arg5: memref<64x1xf32, #tpu.memory_space<vmem>>, %arg6: memref<16x1xf32, #tpu.memory_space<vmem>>, %arg7: memref<1xf32, #tpu.memory_space<smem>>, %arg8: memref<128x1xf32, #tpu.memory_space<vmem>>) attributes {dimension_semantics = [#tpu.dimension_semantics<parallel>], iteration_bounds = array<i64: 1>, scalar_prefetch = 0 : i64, scratch_operands = 0 : i64, tpu.core_type = #tpu.core_type<tc>, window_params = [{transform_indices = @transform_0, window_bounds = array<i64: 128, 32>}, {transform_indices = @transform_1, window_bounds = array<i64: 128, 64>}, {transform_indices = @transform_2, window_bounds = array<i64: 128, 16>}, {pipeline_mode = #tpu.pipeline_mode<synchronous>, transform_indices = @transform_3, window_bounds = array<i64: 32, 1>}, {pipeline_mode = #tpu.pipeline_mode<synchronous>, transform_indices = @transform_4, window_bounds = array<i64: 64, 1>}, {pipeline_mode = #tpu.pipeline_mode<synchronous>, transform_indices = @transform_5, window_bounds = array<i64: 16, 1>}, {transform_indices = @transform_6, window_bounds = array<i64: 1>}, {transform_indices = @transform_7, window_bounds = array<i64: 128, 1>}]} {
    %c0 = arith.constant 0 : index
    %c0_0 = arith.constant 0 : index
    %0 = vector.load %arg1[%c0, %c0_0] : memref<128x32xf32, #tpu.memory_space<vmem>>, vector<128x32xf32>
    %c0_1 = arith.constant 0 : index
    %c0_2 = arith.constant 0 : index
    %1 = vector.load %arg4[%c0_1, %c0_2] : memref<32x1xf32, #tpu.memory_space<vmem>>, vector<32x1xf32>
    %cst = arith.constant dense<0.000000e+00> : vector<128x1xf32>
    %2 = tpu.matmul %0, %1, %cst {dimension_numbers = #tpu.dot_dimension_numbers<[1], [0], [0], [1], [0, 0, 1, 1], [], []>} : vector<128x32xf32>, vector<32x1xf32>, vector<128x1xf32> -> vector<128x1xf32>
    %c0_3 = arith.constant 0 : index
    %c0_4 = arith.constant 0 : index
    %3 = vector.load %arg2[%c0_3, %c0_4] : memref<128x64xf32, #tpu.memory_space<vmem>>, vector<128x64xf32>
    %c0_5 = arith.constant 0 : index
    %c0_6 = arith.constant 0 : index
    %4 = vector.load %arg5[%c0_5, %c0_6] : memref<64x1xf32, #tpu.memory_space<vmem>>, vector<64x1xf32>
    %cst_7 = arith.constant dense<0.000000e+00> : vector<128x1xf32>
    %5 = tpu.matmul %3, %4, %cst_7 {dimension_numbers = #tpu.dot_dimension_numbers<[1], [0], [0], [1], [0, 0, 1, 1], [], []>} : vector<128x64xf32>, vector<64x1xf32>, vector<128x1xf32> -> vector<128x1xf32>
    %6 = arith.addf %2, %5 : vector<128x1xf32>
    %c0_8 = arith.constant 0 : index
    %c0_9 = arith.constant 0 : index
    %7 = vector.load %arg3[%c0_8, %c0_9] : memref<128x16xf32, #tpu.memory_space<vmem>>, vector<128x16xf32>
    %c0_10 = arith.constant 0 : index
    %c0_11 = arith.constant 0 : index
    %8 = vector.load %arg6[%c0_10, %c0_11] : memref<16x1xf32, #tpu.memory_space<vmem>>, vector<16x1xf32>
    %cst_12 = arith.constant dense<0.000000e+00> : vector<128x1xf32>
    %9 = tpu.matmul %7, %8, %cst_12 {dimension_numbers = #tpu.dot_dimension_numbers<[1], [0], [0], [1], [0, 0, 1, 1], [], []>} : vector<128x16xf32>, vector<16x1xf32>, vector<128x1xf32> -> vector<128x1xf32>
    %10 = arith.addf %6, %9 : vector<128x1xf32>
    %c0_13 = arith.constant 0 : index
    %11 = memref.load %arg7[%c0_13] : memref<1xf32, #tpu.memory_space<smem>>
    %12 = vector.broadcast %11 : f32 to vector<128x1xf32>
    %13 = arith.addf %10, %12 : vector<128x1xf32>
    %c0_14 = arith.constant 0 : index
    %c0_15 = arith.constant 0 : index
    %14 = vector.load %arg8[%c0_14, %c0_15] : memref<128x1xf32, #tpu.memory_space<vmem>>, vector<128x1xf32>
    tpu.vector_store %arg8[%c0_14, %c0_15], %13 {strides = array<i32>} : memref<128x1xf32, #tpu.memory_space<vmem>>, vector<128x1xf32>,
    return
  }
  func.func @transform_0(%arg0: i32) -> (i32, i32) {
    %c0_i32 = arith.constant 0 : i32
    %c0_i32_0 = arith.constant 0 : i32
    return %arg0, %c0_i32 : i32, i32
  }
  func.func @transform_1(%arg0: i32) -> (i32, i32) {
    %c0_i32 = arith.constant 0 : i32
    %c0_i32_0 = arith.constant 0 : i32
    return %arg0, %c0_i32 : i32, i32
  }
  func.func @transform_2(%arg0: i32) -> (i32, i32) {
    %c0_i32 = arith.constant 0 : i32
    %c0_i32_0 = arith.constant 0 : i32
    return %arg0, %c0_i32 : i32, i32
  }
  func.func @transform_3(%arg0: i32) -> (i32, i32) {
    %c0_i32 = arith.constant 0 : i32
    %c0_i32_0 = arith.constant 0 : i32
    %c0_i32_1 = arith.constant 0 : i32
    return %c0_i32, %c0_i32_0 : i32, i32
  }
  func.func @transform_4(%arg0: i32) -> (i32, i32) {
    %c0_i32 = arith.constant 0 : i32
    %c0_i32_0 = arith.constant 0 : i32
    %c0_i32_1 = arith.constant 0 : i32
    return %c0_i32, %c0_i32_0 : i32, i32
  }
  func.func @transform_5(%arg0: i32) -> (i32, i32) {
    %c0_i32 = arith.constant 0 : i32
    %c0_i32_0 = arith.constant 0 : i32
    %c0_i32_1 = arith.constant 0 : i32
    return %c0_i32, %c0_i32_0 : i32, i32
  }
  func.func @transform_6(%arg0: i32) -> i32 {
    %c0_i32 = arith.constant 0 : i32
    %c0_i32_0 = arith.constant 0 : i32
    return %c0_i32 : i32
  }
  func.func @transform_7(%arg0: i32) -> (i32, i32) {
    %c0_i32 = arith.constant 0 : i32
    %c0_i32_0 = arith.constant 0 : i32
    return %arg0, %c0_i32 : i32, i32
  }
}

</mosaic_0001>

<bundles_post_ra>
// kernel: tpu_custom_call.1
= control target key start
LH: loop header
LB: loop body
LE: loop exit
PB: predicated region body
PF: predicated region fallthrough
CT: control target
= control target key end

     0   :  { %vm265_vm0 = vcmask 261120   ;;  %vm71_vm1 = vcmask 523264   ;;  %vm477_vm2 = vcmask 130048   ;;  %vm705_vm3 = vcmask 7168   ;;  %s1323_s0 = inlined_call_operand.vmem [shape: f32[16,32], index: 0, kind: input, shape index: {}]   ;;  %s1324_s1 = inlined_call_operand.vmem [shape: f32[16,64], index: 1, kind: input, shape index: {}]   ;;  %s1325_s2 = inlined_call_operand.vmem [shape: f32[16,16], index: 2, kind: input, shape index: {}]   ;;  %s1326_s3 = inlined_call_operand.vmem [shape: f32[32,1], index: 3, kind: input, shape index: {}]   ;;  %s1327_s4 = inlined_call_operand.vmem [shape: f32[64,1], index: 4, kind: input, shape index: {}]   ;;  %s1328_s5 = inlined_call_operand.vmem [shape: f32[16,1], index: 5, kind: input, shape index: {}]   ;;  %s1329_s6 = inlined_call_operand.<no memory space> [shape: f32[1], index: 6, kind: input, shape index: {}]   ;;  %s1330_s7 = inlined_call_operand.vmem [shape: f32[16,1], index: 7, kind: output, shape index: {}]  }
   0x1   :  { %v63_v0 = vld [vmem:[%s1327_s4] sm:$0xff]  ;;  %v64_v1 = vld [vmem:[%s1327_s4 + $0x8] sm:$0xff]  ;;  %v65_v5 = vld [vmem:[%s1327_s4 + $0x10] sm:$0xff] }
   0x2   :  { %v43_v2 = vld [vmem:[%s1326_s3] sm:$0xff]  ;;  %v976_v3 = vpack.c.bf16 %v64_v1, %v63_v0  ;;  %v44_v4 = vld [vmem:[%s1326_s3 + $0x8] sm:$0xff]  ;;  %v66_v6 = vld [vmem:[%s1327_s4 + $0x18] sm:$0xff] }
   0x3   :  { %v992_v7 = vpack.c.bf16 %v44_v4, %v43_v2  ;;  %v980_v8 = vpack.c.bf16 %v66_v6, %v65_v5  ;;  %v45_v9 = vld [vmem:[%s1326_s3 + $0x10] sm:$0xff]  ;;  %v46_v10 = vld [vmem:[%s1326_s3 + $0x18] sm:$0xff]  ;;  %v27_v11 = vld [vmem:[%s1323_s0] sm:$0xff] }
   0x4   :  { %977 = vmatprep.subr.bf16.mxu1 %v976_v3  ;;  %v996_v12 = vpack.c.bf16 %v46_v10, %v45_v9  ;;  %924 = vmatprep.mubr.msk.f32.mxu0 %vm265_vm0, %v27_v11  ;;  %v67_v13 = vld [vmem:[%s1327_s4 + $0x20] sm:$0xff]  ;;  %v68_v14 = vld [vmem:[%s1327_s4 + $0x28] sm:$0xff]  ;;  %v69_v20 = vld [vmem:[%s1327_s4 + $0x30] sm:$0xff] }
   0x5   :  { %993 = vmatprep.subr.bf16.mxu0 %v992_v7  ;;  %979 = vmatpush3.bf16.msra.mxu1 %v976_v3  ;;  %v475_v15 = vld [vmem:[%s1328_s5] sm:$0xff]  ;;  %v476_v16 = vld [vmem:[%s1328_s5 + $0x8] sm:$0xff]  ;;  %v984_v17 = vpack.c.bf16 %v68_v14, %v67_v13  ;;  %v70_v21 = vld [vmem:[%s1327_s4 + $0x38] sm:$0xff]  ;;  %v688_v13 = vstv %s1329_s6 }
   0x6   :  { %995 = vmatpush3.bf16.msra.mxu0 %v992_v7  ;;  %981 = vmatprep.subr.bf16.mxu1 %v980_v8  ;;  %v1000_v18 = vpack.c.bf16 %v476_v16, %v475_v15  ;;  %v47_v19 = vld [vmem:[%s1324_s1] sm:$0xff]  ;;  %v28_v22 = vld [vmem:[%s1323_s0 + $0x8] sm:$0xff]  ;;  %v29_v23 = vld [vmem:[%s1323_s0 + $0x10] sm:$0xff]  ;;  %v988_v24 = vpack.c.bf16 %v70_v21, %v69_v20 }
   0x7   :  { %997 = vmatprep.subr.bf16.mxu0 %v996_v12  ;;  %892 = vmatprep.mubr.msk.f32.mxu1 %vm71_vm1, %v47_v19  ;;  %v30_v25 = vld [vmem:[%s1323_s0 + $0x18] sm:$0xff]  ;;  %v31_v26 = vld [vmem:[%s1323_s0 + $0x20] sm:$0xff]  ;;  %v48_v27 = vld [vmem:[%s1324_s1 + $0x8] sm:$0xff] }
   0x8   :  { %v32_v28 = vld [vmem:[%s1323_s0 + $0x28] sm:$0xff]  ;;  %v49_v29 = vld [vmem:[%s1324_s1 + $0x10] sm:$0xff]  ;;  %v50_v31 = vld [vmem:[%s1324_s1 + $0x18] sm:$0xff] }
   0x9   :  { %983 = vmatpush3.bf16.msra.mxu1 %v980_v8  ;;  %v33_v30 = vld [vmem:[%s1323_s0 + $0x30] sm:$0xff]  ;;  %v34_v32 = vld [vmem:[%s1323_s0 + $0x38] sm:$0xff]  ;;  %v51_v33 = vld [vmem:[%s1324_s1 + $0x20] sm:$0xff] }
   0xa   :  { %999 = vmatpush3.bf16.msra.mxu0 %v996_v12  ;;  %985 = vmatprep.subr.bf16.mxu1 %v984_v17  ;;  %v35_v34 = vld [vmem:[%s1323_s0 + $0x40] sm:$0xff]  ;;  %v52_v35 = vld [vmem:[%s1324_s1 + $0x28] sm:$0xff]  ;;  %v53_v37 = vld [vmem:[%s1324_s1 + $0x30] sm:$0xff] }
   0xb   :  { %1001 = vmatprep.subr.bf16.mxu0 %v1000_v18  ;;  %v36_v36 = vld [vmem:[%s1323_s0 + $0x48] sm:$0xff]  ;;  %v459_v38 = vld [vmem:[%s1325_s2] sm:$0xff]  ;;  %v54_v39 = vld [vmem:[%s1324_s1 + $0x38] sm:$0xff] }
   0xc   :  { %v460_v40 = vld [vmem:[%s1325_s2 + $0x8] sm:$0xff]  ;;  %v55_v41 = vld [vmem:[%s1324_s1 + $0x40] sm:$0xff]  ;;  %v461_v42 = vld [vmem:[%s1325_s2 + $0x10] sm:$0xff] }
   0xd   :  { %925 = vmatmul.mubr.msk.f32.vlgmr.msra.gmra.mrb[0].mxu0 %vm265_vm0, %v28_v22  ;;  %987 = vmatpush3.bf16.msra.mxu1 %v984_v17  ;;  %v56_v43 = vld [vmem:[%s1324_s1 + $0x48] sm:$0xff]  ;;  %v462_v44 = vld [vmem:[%s1325_s2 + $0x18] sm:$0xff]  ;;  %v57_v45 = vld [vmem:[%s1324_s1 + $0x50] sm:$0xff] }
   0xe   :  { %1003 = vmatpush3.bf16.msra.mxu0 %v1000_v18  ;;  %927 = vmatprep.mubr.msk.f32.mxu0 %vm265_vm0, %v29_v23  ;;  %v463_v46 = vld [vmem:[%s1325_s2 + $0x20] sm:$0xff]  ;;  %v58_v47 = vld [vmem:[%s1324_s1 + $0x58] sm:$0xff]  ;;  %v464_v48 = vld [vmem:[%s1325_s2 + $0x28] sm:$0xff] }
   0xf   :  { %989 = vmatprep.subr.bf16.mxu1 %v988_v24  ;;  %v59_v49 = vld [vmem:[%s1324_s1 + $0x60] sm:$0xff]  ;;  %v465_v50 = vld [vmem:[%s1325_s2 + $0x30] sm:$0xff]  ;;  %v60_v51 = vld [vmem:[%s1324_s1 + $0x68] sm:$0xff] }
  0x10   :  { %v466_v52 = vld [vmem:[%s1325_s2 + $0x38] sm:$0xff]  ;;  %v61_v53 = vld [vmem:[%s1324_s1 + $0x70] sm:$0xff]  ;;  %v467_v54 = vld [vmem:[%s1325_s2 + $0x40] sm:$0xff] }
  0x11   :  { %928 = vmatmul.mubr.msk.f32.gmra.mrb[2].mxu0 %vm265_vm0, %v30_v25  ;;  %991 = vmatpush3.bf16.msra.mxu1 %v988_v24  ;;  %v62_v55 = vld [vmem:[%s1324_s1 + $0x78] sm:$0xff]  ;;  %v468_v56 = vld [vmem:[%s1325_s2 + $0x48] sm:$0xff]  ;;  %v37_v57 = vld [vmem:[%s1323_s0 + $0x50] sm:$0xff] }
  0x12   :  { %930 = vmatprep.mubr.msk.f32.mxu0 %vm265_vm0, %v31_v26  ;;  %1004 = vmatprep.subr.bf16.mxu1 %v992_v7  ;;  %v469_v58 = vld [vmem:[%s1325_s2 + $0x50] sm:$0xff]  ;;  %v38_v59 = vld [vmem:[%s1323_s0 + $0x58] sm:$0xff]  ;;  %v39_v61 = vld [vmem:[%s1323_s0 + $0x60] sm:$0xff] }
  0x13   :  { %v470_v60 = vld [vmem:[%s1325_s2 + $0x58] sm:$0xff]  ;;  %v471_v62 = vld [vmem:[%s1325_s2 + $0x60] sm:$0xff]  ;;  %v40_v63 = vld [vmem:[%s1323_s0 + $0x68] sm:$0xff] }
  0x14   :  { %893 = vmatmul.mubr.msk.f32.vlgmr.msra.gmra.mrb[0].mxu1 %vm71_vm1, %v48_v27  ;;  %v472_v0 = vld [vmem:[%s1325_s2 + $0x68] sm:$0xff]  ;;  %v41_v1 = vld [vmem:[%s1323_s0 + $0x70] sm:$0xff]  ;;  %v42_v3 = vld [vmem:[%s1323_s0 + $0x78] sm:$0xff] }
  0x15   :  { %931 = vmatmul.mubr.msk.f32.gmra.mrb[4].mxu0 %vm265_vm0, %v32_v28  ;;  %1006 = vmatpush3.bf16.msra.mxu1 %v992_v7  ;;  %v473_v2 = vld [vmem:[%s1325_s2 + $0x70] sm:$0xff]  ;;  %v474_v4 = vld [vmem:[%s1325_s2 + $0x78] sm:$0xff] }
  0x16   :  { %895 = vmatprep.mubr.msk.f32.mxu1 %vm71_vm1, %v49_v29  ;;  %933 = vmatprep.mubr.msk.f32.mxu0 %vm265_vm0, %v33_v30 }
  0x17   :  { %1005 = vmatprep.subr.bf16.mxu1 %v996_v12 }
  0x18   :  { %896 = vmatmul.mubr.msk.f32.gmra.mrb[2].mxu1 %vm71_vm1, %v50_v31 }
  0x19   :  { %934 = vmatmul.mubr.msk.f32.gmra.mrb[6].mxu0 %vm265_vm0, %v34_v32  ;;  %898 = vmatprep.mubr.msk.f32.mxu1 %vm71_vm1, %v51_v33 }
  0x1a   :  { %936 = vmatprep.mubr.msk.f32.mxu0 %vm265_vm0, %v35_v34  ;;  %1007 = vmatpush3.bf16.msra.mxu1 %v996_v12 }
  0x1c   :  { %899 = vmatmul.mubr.msk.f32.gmra.mrb[4].mxu1 %vm71_vm1, %v52_v35 }
  0x1d   :  { %937 = vmatmul.mubr.msk.f32.gmra.mrb[8].mxu0 %vm265_vm0, %v36_v36  ;;  %901 = vmatprep.mubr.msk.f32.mxu1 %vm71_vm1, %v53_v37 }
  0x1e   :  { %952 = vmatprep.mubr.msk.f32.mxu0 %vm477_vm2, %v459_v38 }
  0x20   :  { %902 = vmatmul.mubr.msk.f32.gmra.mrb[6].mxu1 %vm71_vm1, %v54_v39 }
  0x21   :  { %953 = vmatmul.mubr.msk.f32.vlgmr.msra.gmra.mrb[0].mxu0 %vm477_vm2, %v460_v40  ;;  %904 = vmatprep.mubr.msk.f32.mxu1 %vm71_vm1, %v55_v41 }
  0x22   :  { %955 = vmatprep.mubr.msk.f32.mxu0 %vm477_vm2, %v461_v42 }
  0x24   :  { %905 = vmatmul.mubr.msk.f32.gmra.mrb[8].mxu1 %vm71_vm1, %v56_v43 }
  0x25   :  { %956 = vmatmul.mubr.msk.f32.gmra.mrb[2].mxu0 %vm477_vm2, %v462_v44  ;;  %907 = vmatprep.mubr.msk.f32.mxu1 %vm71_vm1, %v57_v45 }
  0x26   :  { %958 = vmatprep.mubr.msk.f32.mxu0 %vm477_vm2, %v463_v46 }
  0x28   :  { %908 = vmatmul.mubr.msk.f32.gmra.mrb[10].mxu1 %vm71_vm1, %v58_v47 }
  0x29   :  { %959 = vmatmul.mubr.msk.f32.gmra.mrb[4].mxu0 %vm477_vm2, %v464_v48  ;;  %910 = vmatprep.mubr.msk.f32.mxu1 %vm71_vm1, %v59_v49 }
  0x2a   :  { %961 = vmatprep.mubr.msk.f32.mxu0 %vm477_vm2, %v465_v50 }
  0x2c   :  { %911 = vmatmul.mubr.msk.f32.gmra.mrb[12].mxu1 %vm71_vm1, %v60_v51 }
  0x2d   :  { %962 = vmatmul.mubr.msk.f32.gmra.mrb[6].mxu0 %vm477_vm2, %v466_v52  ;;  %913 = vmatprep.mubr.msk.f32.mxu1 %vm71_vm1, %v61_v53 }
  0x2e   :  { %964 = vmatprep.mubr.msk.f32.mxu0 %vm477_vm2, %v467_v54 }
  0x30   :  { %914 = vmatmul.mubr.msk.f32.gmra.mrb[14].mxu1 %vm71_vm1, %v62_v55 }
  0x31   :  { %965 = vmatmul.mubr.msk.f32.gmra.mrb[8].mxu0 %vm477_vm2, %v468_v56  ;;  %939 = vmatprep.mubr.msk.f32.mxu1 %vm265_vm0, %v37_v57 }
  0x32   :  { %967 = vmatprep.mubr.msk.f32.mxu0 %vm477_vm2, %v469_v58 }
  0x34   :  { %940 = vmatmul.mubr.msk.f32.vlgmr.msra.gmra.mrb[10].mxu1 %vm265_vm0, %v38_v59 }
  0x35   :  { %968 = vmatmul.mubr.msk.f32.gmra.mrb[10].mxu0 %vm477_vm2, %v470_v60  ;;  %942 = vmatprep.mubr.msk.f32.mxu1 %vm265_vm0, %v39_v61 }
  0x36   :  { %970 = vmatprep.mubr.msk.f32.mxu0 %vm477_vm2, %v471_v62 }
  0x38   :  { %943 = vmatmul.mubr.msk.f32.gmra.mrb[12].mxu1 %vm265_vm0, %v40_v63 }
  0x39   :  { %971 = vmatmul.mubr.msk.f32.gmra.mrb[12].mxu0 %vm477_vm2, %v472_v0  ;;  %945 = vmatprep.mubr.msk.f32.mxu1 %vm265_vm0, %v41_v1 }
  0x3a   :  { %973 = vmatprep.mubr.msk.f32.mxu0 %vm477_vm2, %v473_v2 }
  0x3c   :  { %946 = vmatmul.mubr.msk.f32.gmra.mrb[14].mxu1 %vm265_vm0, %v42_v3 }
  0x3d   :  { %974 = vmatmul.mubr.msk.f32.gmra.mrb[14].mxu0 %vm477_vm2, %v474_v4 }
  0xe7   :  { %v894_v5 = vpop.f32.mrb[0].mxu1 }
  0xe8   :  { %v186_v6 = vpop.f32.mrb[1].mxu1 }
  0xeb   :  { %v897_v7 = vpop.f32.mrb[2].mxu1 }
  0xec   :  { %v196_v8 = vpop.f32.mrb[3].mxu1 }
  0xef   :  { %v900_v9 = vpop.f32.mrb[4].mxu1 }
  0xf0   :  { %v206_v10 = vpop.f32.mrb[5].mxu1 }
  0xf3   :  { %v903_v11 = vpop.f32.mrb[6].mxu1 }
  0xf4   :  { %v954_v12 = vpop.f32.mrb[0].mxu0  ;;  %v216_v14 = vpop.f32.mrb[7].mxu1 }
  0xf5   :  { %v1008_v15 = vadd.f32 %v954_v12, %v894_v5  ;;  %v592_v16 = vpop.f32.mrb[1].mxu0 }
  0xf6   :  { %v1009_v17 = vadd.f32 %v592_v16, %v186_v6 }
  0xf7   :  { %v690_v18 = vadd.f32 %v1008_v15, %v688_v13  ;;  %v906_v19 = vpop.f32.mrb[8].mxu1 }
  0xf8   :  { %v689_v20 = vadd.f32 %v1009_v17, %v688_v13  ;;  %v957_v21 = vpop.f32.mrb[2].mxu0  ;;  %v226_v22 = vpop.f32.mrb[9].mxu1 }
  0xf9   :  { %707 = vst.msk [vmem:[#allocation3 + $0x8] sm:$0xff] %vm705_vm3, %v690_v18  ;;  %v602_v23 = vpop.f32.mrb[3].mxu0 }
  0xfa   :  { %706 = vst.msk [vmem:[#allocation3] sm:$0xff] %vm705_vm3, %v689_v20 }
  0xfc   :  { %v960_v24 = vpop.f32.mrb[4].mxu0 }
  0xfd   :  { %v612_v25 = vpop.f32.mrb[5].mxu0 }
 0x100   :  { %v755_v26 = vld [vmem:[#allocation3 + $0x8] sm:$0xff]  ;;  %v963_v27 = vpop.f32.mrb[6].mxu0 }
 0x101   :  { %756 = vst [vmem:[%s1330_s7 + $0x8] sm:$0xff] %v755_v26  ;;  %v753_v28 = vld [vmem:[#allocation3] sm:$0xff]  ;;  %v622_v29 = vpop.f32.mrb[7].mxu0 }
 0x102   :  { %754 = vst [vmem:[%s1330_s7] sm:$0xff] %v753_v28 }
 0x104   :  { %v966_v30 = vpop.f32.mrb[8].mxu0 }
 0x105   :  { %v632_v31 = vpop.f32.mrb[9].mxu0 }
 0x107   :  { %v941_v32 = vpop.f32.mrb[10].mxu1 }
 0x108   :  { %v969_v33 = vpop.f32.mrb[10].mxu0  ;;  %v430_v34 = vpop.f32.mrb[11].mxu1 }
 0x109   :  { %v642_v35 = vpop.f32.mrb[11].mxu0 }
 0x10b   :  { %v944_v36 = vpop.f32.mrb[12].mxu1 }
 0x10c   :  { %v972_v37 = vpop.f32.mrb[12].mxu0  ;;  %v440_v38 = vpop.f32.mrb[13].mxu1 }
 0x10d   :  { %v652_v39 = vpop.f32.mrb[13].mxu0 }
 0x10f   :  { %v947_v40 = vpop.f32.mrb[14].mxu1 }
 0x110   :  { %v975_v41 = vpop.f32.mrb[14].mxu0  ;;  %v450_v42 = vpop.f32.mrb[15].mxu1 }
 0x111   :  { %v662_v43 = vpop.f32.mrb[15].mxu0 }

</bundles_post_ra>
